<compile_context>
chip_gen: v7x
topology: tpu7x:2x2x1
jax: 0.10.0
libtpu: 0.0.40
codegen_flags: <defaults>
</compile_context>

<pallas_src>
import jax
import jax.numpy as jnp
from jax.experimental import pallas as pl
from jax.experimental.pallas import tpu as pltpu


def _round_up(x: int, m: int) -> int:
    return ((x + m - 1) // m) * m


def attention_kernel(z_ref, w_ref, out_ref, beta_ref):
    # z_ref:    (TB, N, D) VMEM, native dtype
    # w_ref:    (D, 1)     VMEM, z dtype (projection weight column)
    # out_ref:  (TB, D)    VMEM
    # beta_ref: (TB, N)    VMEM (lane-dense attention weights)
    tb, n, d = z_ref.shape
    z = z_ref[...]                                   # native dtype, no slab upcast
    w_col = w_ref[...]                               # (D, 1)

    # logits[b, n] = sum_d z[b, n, d] * w[d]  -- MXU contraction on the merged block.
    z2 = z.reshape(tb * n, d)                        # leading-dim merge (layout-free)
    logits = jnp.dot(
        z2, w_col,
        preferred_element_type=jnp.float32,
        precision=jax.lax.Precision.HIGHEST,         # exact f32 (tiny 1-column matmul)
    )                                                # (TB*N, 1)
    logits = logits.reshape(tb, n)                   # small relayout on the logits tile only

    # Numerically stable softmax over the sequence axis N (lane reduces on (TB, N)).
    m = jnp.max(logits, axis=-1, keepdims=True)      # (TB, 1)
    e = jnp.exp(logits - m)                          # (TB, N)
    denom = jnp.sum(e, axis=-1, keepdims=True)       # (TB, 1)
    beta = e * pl.reciprocal(denom, approx=False)    # exact divide: keep 1e-5 parity

    beta_ref[...] = beta.astype(beta_ref.dtype)

    # pooled[b, d] = sum_n beta[b, n] * z[b, n, d]
    beta_n = beta.astype(z.dtype)                    # cast the small tile, not the slab
    if n >= 128:
        # MXU batched contraction: keeps the VPU free on v7x for large N.
        pooled = jnp.einsum("bn,bnd->bd", beta_n, z,
                            preferred_element_type=jnp.float32)
    else:
        # Native-dtype multiply + f32-accumulated reduce over the sequence axis.
        pooled = jnp.sum(beta_n[:, :, None] * z, axis=1, dtype=jnp.float32)
    out_ref[...] = pooled.astype(out_ref.dtype)


def attention_forward(z, weight, bias=None, *, tb=None):
    """z: (B, N, D); weight: (1, D); bias: (1,) — matches nn.Linear(D, 1).

    Returns (out (B, D), beta (B, N, 1)) like the PyTorch module.  Bias is accepted for
    API parity but is a mathematical no-op for both outputs (softmax over the sequence
    axis is shift-invariant).  Outputs come back in z.dtype (beta loses precision vs the
    PyTorch f32 softmax when z is bf16).
    """
    del bias
    B, N, D = z.shape
    itemsize = jnp.dtype(z.dtype).itemsize
    row_bytes = max(N * D * itemsize, 1)

    if tb is None:
        # ~2 MiB z block: double-buffered input + in-kernel temps stay well under v5e's
        # 16 MiB default scoped VMEM (and far under v6e/v7x budgets).
        cap_rows = max(8, ((2 << 20) // row_bytes) // 8 * 8)
        b8 = _round_up(B, 8)
        # Prefer >= 4 grid steps when B allows it, so each v7x TensorCore (megacore
        # sharding over the parallel batch axis) still gets >= 2 steps to pipeline.
        steps_rows = max(8, (b8 // 4) // 8 * 8)
        tb = max(8, min(cap_rows, steps_rows, b8))

    Bp = _round_up(max(B, tb), tb)
    z_p = z if Bp == B else jnp.pad(z, ((0, Bp - B), (0, 0), (0, 0)))

    # Weight as a (D, 1) column in z's dtype: hoists the transpose/cast out of the
    # kernel and keeps the in-kernel matmul single-dtype.
    w_col = weight.reshape(D, 1).astype(z.dtype)

    # Explicit VMEM budget: double-buffered I/O blocks + beta*z product + small f32 tiles.
    z_block = tb * N * D * itemsize
    io_bytes = 2 * z_block + 2 * (tb * D + tb * N) * itemsize
    temp_bytes = tb * N * D * itemsize + 4 * tb * N * 4
    vmem_bytes = int(min(32 << 20, max(16 << 20, io_bytes + temp_bytes + (2 << 20))))

    out_shapes = (
        jax.ShapeDtypeStruct((Bp, D), z.dtype),   # pooled output
        jax.ShapeDtypeStruct((Bp, N), z.dtype),   # lane-dense beta
    )

    grid_spec = pltpu.PrefetchScalarGridSpec(
        num_scalar_prefetch=0,
        grid=(Bp // tb,),
        in_specs=[
            pl.BlockSpec((tb, N, D), lambda i: (i, 0, 0)),   # z slab
            pl.BlockSpec((D, 1), lambda i: (0, 0)),          # projection weight column
        ],
        out_specs=[
            pl.BlockSpec((tb, D), lambda i: (i, 0)),
            pl.BlockSpec((tb, N), lambda i: (i, 0)),
        ],
    )

    out_p, beta_p = pl.pallas_call(
        attention_kernel,
        out_shape=out_shapes,
        grid_spec=grid_spec,
        compiler_params=pltpu.CompilerParams(
            dimension_semantics=("parallel",),
            vmem_limit_bytes=vmem_bytes,
        ),
    )(z_p, w_col)

    out = out_p[:B]
    beta = beta_p[:B, :, None]   # (B, N, 1) to match the PyTorch module
    return out, beta


def attention_reference(z, weight, bias):
    """Pure-JAX reference mirroring the PyTorch forward (including bias)."""
    logits = jnp.einsum("bnd,od->bno", z, weight) + bias   # (B, N, 1)
    beta = jax.nn.softmax(logits, axis=1)
    out = jnp.sum(beta * z, axis=1)
    return out, beta


if __name__ == "__main__":
    key = jax.random.PRNGKey(0)
    k_z, k_w, k_b = jax.random.split(key, 3)

    B, N, D = 16, 8, 32   # batch, seq, in_size (module's hidden_size is unused by forward)

    z = jax.random.normal(k_z, (B, N, D), dtype=jnp.float32)

    # Deterministic Linear(in_size, 1) init (uniform +-1/sqrt(in_size), like PyTorch default)
    bound = 1.0 / jnp.sqrt(jnp.float32(D))
    weight = jax.random.uniform(k_w, (1, D), minval=-bound, maxval=bound, dtype=jnp.float32)
    bias = jax.random.uniform(k_b, (1,), minval=-bound, maxval=bound, dtype=jnp.float32)

    out, beta = attention_forward(z, weight, bias)
    out = jax.block_until_ready(out)
    beta = jax.block_until_ready(beta)

    out_ref, beta_ref = attention_reference(z, weight, bias)
    assert out.shape == (B, D) and beta.shape == (B, N, 1)
    assert jnp.allclose(out, out_ref, atol=1e-5, rtol=1e-5), "pooled output mismatch"
    assert jnp.allclose(beta, beta_ref, atol=1e-5, rtol=1e-5), "beta mismatch"

    print("KERNEL_OK")
</pallas_src>

<mosaic_0001>
module attributes {stable_mosaic.version = 11 : i64} {
  func.func @attention_kernel(%arg0: i32, %arg1: memref<8x8x32xf32, #tpu.memory_space<vmem>>, %arg2: memref<32x1xf32, #tpu.memory_space<vmem>>, %arg3: memref<8x32xf32, #tpu.memory_space<vmem>>, %arg4: memref<8x8xf32, #tpu.memory_space<vmem>>) attributes {dimension_semantics = [#tpu.dimension_semantics<parallel>], iteration_bounds = array<i64: 2>, scalar_prefetch = 0 : i64, scratch_operands = 0 : i64, tpu.core_type = #tpu.core_type<tc>, window_params = [{transform_indices = @transform_0, window_bounds = array<i64: 8, 8, 32>}, {pipeline_mode = #tpu.pipeline_mode<synchronous>, transform_indices = @transform_1, window_bounds = array<i64: 32, 1>}, {transform_indices = @transform_2, window_bounds = array<i64: 8, 32>}, {transform_indices = @transform_3, window_bounds = array<i64: 8, 8>}]} {
    %c0 = arith.constant 0 : index
    %c0_0 = arith.constant 0 : index
    %c0_1 = arith.constant 0 : index
    %0 = vector.load %arg1[%c0, %c0_0, %c0_1] : memref<8x8x32xf32, #tpu.memory_space<vmem>>, vector<8x8x32xf32>
    %c0_2 = arith.constant 0 : index
    %c0_3 = arith.constant 0 : index
    %1 = vector.load %arg2[%c0_2, %c0_3] : memref<32x1xf32, #tpu.memory_space<vmem>>, vector<32x1xf32>
    %2 = vector.shape_cast %0 : vector<8x8x32xf32> to vector<64x32xf32>
    %cst = arith.constant dense<0.000000e+00> : vector<64x1xf32>
    %3 = tpu.matmul %2, %1, %cst {dimension_numbers = #tpu.dot_dimension_numbers<[1], [0], [0], [1], [0, 0, 1, 1], [], []>, precision = #tpu.contract_precision<fp32>} : vector<64x32xf32>, vector<32x1xf32>, vector<64x1xf32> -> vector<64x1xf32>
    %4 = vector.shape_cast %3 : vector<64x1xf32> to vector<8x8xf32>
    %cst_4 = arith.constant dense<0xFF800000> : vector<8xf32>
    %5 = vector.multi_reduction <maximumf>, %4, %cst_4 [1] : vector<8x8xf32> to vector<8xf32>
    %6 = vector.shape_cast %5 : vector<8xf32> to vector<8x1xf32>
    %7 = vector.broadcast %6 : vector<8x1xf32> to vector<8x8xf32>
    %8 = arith.subf %4, %7 : vector<8x8xf32>
    %9 = math.exp %8 : vector<8x8xf32>
    %cst_5 = arith.constant dense<0.000000e+00> : vector<8xf32>
    %10 = vector.multi_reduction <add>, %9, %cst_5 [1] : vector<8x8xf32> to vector<8xf32>
    %11 = vector.shape_cast %10 : vector<8xf32> to vector<8x1xf32>
    %12 = tpu.reciprocal %11 : vector<8x1xf32> -> vector<8x1xf32>
    %13 = vector.broadcast %12 : vector<8x1xf32> to vector<8x8xf32>
    %14 = arith.mulf %9, %13 : vector<8x8xf32>
    %c0_6 = arith.constant 0 : index
    %c0_7 = arith.constant 0 : index
    %15 = vector.load %arg4[%c0_6, %c0_7] : memref<8x8xf32, #tpu.memory_space<vmem>>, vector<8x8xf32>
    tpu.vector_store %arg4[%c0_6, %c0_7], %14 {strides = array<i32>} : memref<8x8xf32, #tpu.memory_space<vmem>>, vector<8x8xf32>,
    %16 = vector.shape_cast %14 : vector<8x8xf32> to vector<8x8x1xf32>
    %17 = vector.broadcast %16 : vector<8x8x1xf32> to vector<8x8x32xf32>
    %18 = arith.mulf %17, %0 : vector<8x8x32xf32>
    %cst_8 = arith.constant dense<0.000000e+00> : vector<8x32xf32>
    %19 = vector.multi_reduction <add>, %18, %cst_8 [1] : vector<8x8x32xf32> to vector<8x32xf32>
    %c0_9 = arith.constant 0 : index
    %c0_10 = arith.constant 0 : index
    %20 = vector.load %arg3[%c0_9, %c0_10] : memref<8x32xf32, #tpu.memory_space<vmem>>, vector<8x32xf32>
    tpu.vector_store %arg3[%c0_9, %c0_10], %19 {strides = array<i32>} : memref<8x32xf32, #tpu.memory_space<vmem>>, vector<8x32xf32>,
    return
  }
  func.func @transform_0(%arg0: i32) -> (i32, i32, i32) {
    %c0_i32 = arith.constant 0 : i32
    %c0_i32_0 = arith.constant 0 : i32
    %c0_i32_1 = arith.constant 0 : i32
    return %arg0, %c0_i32, %c0_i32_0 : i32, i32, i32
  }
  func.func @transform_1(%arg0: i32) -> (i32, i32) {
    %c0_i32 = arith.constant 0 : i32
    %c0_i32_0 = arith.constant 0 : i32
    %c0_i32_1 = arith.constant 0 : i32
    return %c0_i32, %c0_i32_0 : i32, i32
  }
  func.func @transform_2(%arg0: i32) -> (i32, i32) {
    %c0_i32 = arith.constant 0 : i32
    %c0_i32_0 = arith.constant 0 : i32
    return %arg0, %c0_i32 : i32, i32
  }
  func.func @transform_3(%arg0: i32) -> (i32, i32) {
    %c0_i32 = arith.constant 0 : i32
    %c0_i32_0 = arith.constant 0 : i32
    return %arg0, %c0_i32 : i32, i32
  }
}

</mosaic_0001>

<bundles_post_ra>
// kernel: tpu_custom_call.1
= control target key start
LH: loop header
LB: loop body
LE: loop exit
PB: predicated region body
PF: predicated region fallthrough
CT: control target
= control target key end

     0   :  { %9 = vsyncpa [#allocation3], 0  ;;  %s2552_s0 = inlined_call_operand.hbm [shape: f32[16,8,32], index: 0, kind: input, shape index: {}]   ;;  %s2553_s1 = inlined_call_operand.vmem [shape: f32[32,1], index: 1, kind: input, shape index: {}]   ;;  %s2554_s2 = inlined_call_operand.hbm [shape: f32[16,32], index: 2, kind: output, shape index: {0}]   ;;  %s2555_s3 = inlined_call_operand.vmem [shape: f32[16,8], index: 3, kind: output, shape index: {1}]  }
   0x1   :  { %11 = vsyncpa [#allocation3 + $0x1], 0 }
   0x2   :  { %12 = vsyncpa [#allocation4], 0 }
   0x3   :  { %14 = vsyncpa [#allocation4 + $0x1], 0  ;;  %s2063_s12 = smov 0   ;;  %s2065_s13 = smov 0  }
   0x4   :  { %s2067_s14 = smov 0   ;;  %s2069_s15 = smov 0  }
   0x5 LB: > { %s2084_s16 = sadd.s32 4294967295, %s2036_s15   ;;  %s1576_s17 = sadd.s32 4294967294, %s2036_s15   ;;  %s2036_s15 = sphi %s2069_s15, %s2568_s15   ;;  %s2032_s14 = sphi %s2067_s14, %s2567_s14   ;;  %s2028_s13 = sphi %s2065_s13, %s2566_s13   ;;  %s2024_s12 = sphi %s2063_s12, %s2565_s12  }
   0x6   : > { %s2088_s18 = sadd.s32 1, %s2036_s15   ;;  %s27_s19 = sadd.s32 1, %s2032_s14 }
   0x7   : > { %s24_s20 = ssub.s32 %s2036_s15, %s2088_s18  ;;  %p34_p0 = scmp.ne.s32.totalorder %s2032_s14, %s2028_s13 }
   0x8   : > { %p25_p1 = scmp.eq.s32.totalorder %s24_s20, 0  ;;  %p35_p2 = scmp.eq.s32.totalorder %s2036_s15, 0 }
   0x9   : > { %p40_p3 = scmp.ne.s32.totalorder %s2028_s13, %s2024_s12  ;;  %p41_p4 = scmp.eq.s32.totalorder %s2084_s16, 0 }
   0xa   : > { %s2100_s21 = scalar_select %p25_p1, %s2032_s14, %s27_s19  }
   0xb   : > { %p2102_p5 = por %p35_p2, %p34_p0  ;;  %p2106_p6 = por %p41_p4, %p40_p3 }
   0xc   : > { %p85_p7 = scmp.eq.s32.totalorder %s2084_s16, 1  ;;  %p91_p8 = scmp.eq.s32.totalorder %s1576_s17, 1 }
   0xd   : > { %p1883_p10 = scmp.lt.s32.totalorder %s2036_s15, 2  ;;  %s140_s26 = sand.u32 1, %s2032_s14  }
   0xe   : > { %p2113_p11 = por %p85_p7, %p34_p0  ;;  %p2117_p12 = por %p91_p8, %p40_p3 }
   0xf   : > { %s1590_s27 = sshll.u32 %s2036_s15, 10  ;;  %s1579_s28 = sshll.u32 %s140_s26, 6 }
  0x10   : > { %s2559_s24 = scalar_select %p2113_p11, 1, 0 }
  0x11   : > { %s2560_s25 = scalar_select %p2117_p12, 1, 0 }
  0x12   : > { %s2126_s4 = scalar_lea.hbm %s2552_s0, %s1590_s27  ;;  %s144_s5 = scalar_lea.vmem [#allocation2], %s1579_s28 }
  0x13   : > { %s151_s6 = sshll.u32 %s144_s5, 4  ;;  %p2130_p13 = pnand %p1883_p10, %p2102_p5  ;;  %s2134_s6 = int_to_ptr.vmem [resolvable:$true] %s151_s6 }
  0x14   : > { %s2136_s8 = scalar_lea.sflag [#allocation3], %s140_s26  ;;  %s1940_s9 = scalar_lea.hbm %s2126_s4, 1024 }
  0x15   : > { %p1941_p0 = scmp.ne.s32.totalorder %s2126_s4, %s1940_s9  ;;  %p1942_p1 = pneg %p2130_p13 }
  0x16   : > { %s1945_s17 = scalar_lea.hbm %s2552_s0, 2048  ;;  %p1946_p4 = scmp.lt.u32.totalorder %s2126_s4, %s2552_s0 }
  0x17   : > { %p1943_p2 = pnand %p1942_p1, %p1941_p0  ;;  %p1947_p5 = scmp.lt.u32.totalorder %s1945_s17, %s1940_s9 }
  0x18   : > { %p1949_p8 = scmp.lt.u32.totalorder %s1940_s9, %s2126_s4 }
  0x19   : > { %p1944_p3 = pneg %p1943_p2  ;;  %p1948_p7 = por %p1947_p5, %p1946_p4 }
  0x1b   : > { %p1950_p10 = por %p1949_p8, %p1948_p7 }
  0x1d   : > { %p1951_p9 = pnand %p1950_p10, %p1944_p3 }
  0x1f   : > { %1954 = shalt.err (!%p1951_p9)
}
  0x20   : > { %s1955_s22 = scalar_lea.vmem %s2134_s6, 1024  ;;  %s2038_s26 = smov [#allocation2]  }
  0x21   : > { %p1956_p0 = scmp.ne.s32.totalorder %s2134_s6, %s1955_s22  ;;  %s1960_s27 = sshll.u32 %s2038_s26, 4  ;;  %s1961_s27 = int_to_ptr.vmem [resolvable:$false] %s1960_s27 }
  0x22   : > { %s1962_s28 = scalar_lea.vmem %s1961_s27, 2048  ;;  %p1963_p11 = scmp.lt.s32.totalorder %s2134_s6, %s1961_s27 }
  0x23   : > { %p1958_p2 = pnand %p1956_p0, %p1942_p1  ;;  %p1964_p4 = scmp.lt.s32.totalorder %s1962_s28, %s1955_s22 }
  0x25   : > { %p1959_p12 = pneg %p1958_p2  ;;  %p1965_p5 = por %p1964_p4, %p1963_p11 }
  0x27   : > { %p1966_p7 = pnand %p1965_p5, %p1959_p12 }
  0x29   : > { %1969 = shalt.err (!%p1966_p7)
}
  0x2a   : > { %s2039_s29 = smov 128   ;;  %s2040_s30 = smov 8  }
  0x2b   : > { %1878 = dma.hbm_to_vmem [thread:$0]  (!%p2130_p13), %s2126_s4, 1024, %s2134_s6, %s2136_s8, %s2039_s29, %s2039_s29, %s2040_s30  }
  0x2c   : > { %p1582_p9 = scmp.ge.s32.totalorder %s2036_s15, 1  ;;  %p159_p1 = scmp.lt.s32.totalorder %s2036_s15, 3 }
  0x2e   : > { %p160_p3 = pnand %p1582_p9, %p159_p1 }
  0x2f   : > { %s2167_s5 = sand.u32 (!%p160_p3), 1, %s2028_s13  }
  0x30   : > { %163 = sbr.rel (%p160_p3) target bundleno = 1123 (0x463), region = 28  ;;  %s1583_s9 = sshll.u32 (!%p160_p3), %s2167_s5, 6 }
  0x31   : > { %s166_s10 = scalar_lea.sflag (!%p160_p3), [#allocation3], %s2167_s5  ;;  %s2171_s11 = scalar_lea.vmem (!%p160_p3), [#allocation2], %s1583_s9 }
  0x37   : > { %2015 = dma.done.wait (%p2106_p6), %s166_s10, 1024  }
  0x38   : > { %2017 = vsyncadd (%p2106_p6), %s166_s10, 4294966272  ;;  %vm213_vm0 = vcmask 261120   ;;  %v209_v0 = vld [vmem:[%s2553_s1] sm:$0xff]  ;;  %v210_v1 = vld [vmem:[%s2553_s1 + $0x8] sm:$0xff]  ;;  %vm1090_vm1 = vcmask 1041409   ;;  %vm1092_vm2 = vcmask 1042434  }
  0x39   : > { %v211_v2 = vld [vmem:[%s2553_s1 + $0x10] sm:$0xff]  ;;  %v239_v3 = vand.u32 4294901760, %v209_v0  ;;  %v242_v4 = vand.u32 4294901760, %v210_v1  ;;  %v2189_v5 = vld [vmem:[%s2553_s1 + $0x18] sm:$0xff]  ;;  %v2192_v7 = vld [vmem:[%s2171_s11] sm:$0xff]  ;;  %vm1094_vm3 = vcmask 1043459  }
  0x3a   : > { %v245_v6 = vand.u32 4294901760, %v211_v2  ;;  %v2195_v8 = vld [vmem:[%s2171_s11 + $0x8] sm:$0xff]  ;;  %v248_v9 = vand.u32 4294901760, %v2189_v5  ;;  %v215_v10 = vsel %vm213_vm0, %v2192_v7, 0  ;;  %v2203_v12 = vld [vmem:[%s2171_s11 + $0x10] sm:$0xff]  ;;  %v2206_v13 = vld [vmem:[%s2171_s11 + $0x18] sm:$0xff] }
  0x3b   : > { %v218_v11 = vsel %vm213_vm0, %v2195_v8, 0  ;;  %v2208_v14 = vpack.c.bf16 %v242_v4, %v239_v3  ;;  %v2210_v15 = vand.u32 4294901760, %v215_v10  ;;  %v2214_v17 = vsub.f32 %v209_v0, %v239_v3  ;;  %v2217_v18 = vld [vmem:[%s2171_s11 + $0x20] sm:$0xff]  ;;  %v2220_v19 = vld [vmem:[%s2171_s11 + $0x28] sm:$0xff]  ;;  %v2278_v48 = vld [vmem:[%s2171_s11 + $0x30] sm:$0xff]  ;;  %p197_p6 = scmp.lt.s32.totalorder %s2084_s16, 1 }
  0x3c   : > { %v2212_v16 = vand.u32 4294901760, %v218_v11  ;;  %v2224_v20 = vpack.c.bf16 %v248_v9, %v245_v6  ;;  %v2226_v21 = vsub.f32 %v210_v1, %v242_v4  ;;  %v221_v22 = vsel %vm213_vm0, %v2203_v12, 0  ;;  %v2287_v57 = vld [vmem:[%s2171_s11 + $0x38] sm:$0xff]  ;;  %s1584_s30 = sshll.u32 %s2167_s5, 3  ;;  %s1587_s9 = sshll.u32 %s2084_s16, 7 }
  0x3d   : > { %v224_v23 = vsel %vm213_vm0, %v2206_v13, 0  ;;  %1784 = vmatprep.subr.bf16.mxu1 %v2208_v14  ;;  %1808 = vmatprep.subr.bf16.mxu0 %v2208_v14  ;;  %v2235_v24 = vsub.f32 %v215_v10, %v2210_v15  ;;  %v390_v26 = vand.u32 4294901760, %v2214_v17  ;;  %v2241_v27 = vand.u32 4294901760, %v221_v22  ;;  %s2471_s22 = scalar_select %p197_p6, %s2084_s16, 1 }
  0x3e   : > { %v2238_v25 = vsub.f32 %v218_v11, %v2212_v16  ;;  %1786 = vmatpush3.bf16.msra.mxu1 %v2208_v14  ;;  %1810 = vmatpush3.bf16.msra.mxu0 %v2208_v14  ;;  %v397_v28 = vand.u32 4294901760, %v2226_v21  ;;  %v2246_v29 = vand.u32 4294901760, %v224_v23  ;;  %v227_v30 = vsel %vm213_vm0, %v2217_v18, 0  ;;  %s189_s10 = scalar_lea.vmem [#allocation5], %s1584_s30  ;;  %s2506_s7 = scalar_lea.hbm %s2554_s2, %s1587_s9 }
  0x3f   : > { %v230_v31 = vsel %vm213_vm0, %v2220_v19, 0  ;;  %1788 = vmatprep.subr.bf16.mxu1 %v2224_v20  ;;  %1812 = vmatprep.subr.bf16.mxu0 %v2224_v20  ;;  %v309_v32 = vand.u32 4294901760, %v2235_v24  ;;  %v391_v34 = vsub.f32 %v2214_v17, %v390_v26  ;;  %v2258_v35 = vsub.f32 %v221_v22, %v2241_v27  ;;  %s1585_s26 = sshll.u32 %s2471_s22, 3  ;;  %s1479_s11 = sshll.u32 %s189_s10, 4  ;;  %s2508_s11 = int_to_ptr.vmem [resolvable:$true] %s1479_s11 }
  0x40   : > { %v319_v33 = vand.u32 4294901760, %v2238_v25  ;;  %v398_v36 = vsub.f32 %v2226_v21, %v397_v28  ;;  %v1815_v37 = vpack.c.bf16 %v397_v28, %v390_v26  ;;  %v2262_v38 = vsub.f32 %v224_v23, %v2246_v29  ;;  %s200_s29 = scalar_lea.vmem %s2555_s3, %s1585_s26  ;;  %s1462_s16 = scalar_lea.sflag [#allocation4], %s2167_s5 }
  0x41   : > { %v2264_v39 = vand.u32 4294901760, %v227_v30  ;;  %v310_v40 = vsub.f32 %v2235_v24, %v309_v32  ;;  %1731 = vmatprep.mubr.f32.mxu0 %v309_v32  ;;  %v392_v42 = vand.u32 4294901760, %v391_v34  ;;  %v329_v43 = vand.u32 4294901760, %v2258_v35  ;;  %s1970_s8 = scalar_lea.vmem %s2508_s11, 128  ;;  %p2562_p12 = scmp.ne.s32.totalorder %s2559_s24, 0 }
  0x42   : > { %v320_v41 = vsub.f32 %v2238_v25, %v319_v33  ;;  %1790 = vmatpush3.bf16.msra.mxu1 %v2224_v20  ;;  %1814 = vmatpush3.bf16.msra.mxu0 %v2224_v20  ;;  %v399_v44 = vand.u32 4294901760, %v398_v36  ;;  %v339_v45 = vand.u32 4294901760, %v2262_v38  ;;  %v2275_v47 = vand.u32 4294901760, %v230_v31  ;;  %p1971_p11 = scmp.ne.s32.totalorder %s2508_s11, %s1970_s8  ;;  %s2042_s17 = smov [#allocation5]  }
  0x43   : > { %v2273_v46 = vsub.f32 %v227_v30, %v2264_v39  ;;  %v311_v49 = vand.u32 4294901760, %v310_v40  ;;  %1816 = vmatprep.subr.bf16.mxu0 %v1815_v37  ;;  %v330_v51 = vsub.f32 %v2258_v35, %v329_v43  ;;  %v403_v52 = vsub.f32 %v211_v2, %v245_v6  ;;  %s1974_s19 = sshll.u32 %s2042_s17, 4  ;;  %s1975_s19 = int_to_ptr.vmem [resolvable:$false] %s1974_s19 }
  0x44   : > { %v321_v50 = vand.u32 4294901760, %v320_v41  ;;  %v1791_v53 = vpack.c.bf16 %v399_v44, %v392_v42  ;;  %v340_v54 = vsub.f32 %v2262_v38, %v339_v45  ;;  %v2284_v56 = vsub.f32 %v230_v31, %v2275_v47  ;;  %p1972_p13 = pnand %p1971_p11, %p2562_p12  ;;  %s1976_s23 = scalar_lea.vmem %s1975_s19, 256 }
  0x45   : > { %v349_v55 = vand.u32 4294901760, %v2273_v46  ;;  %1671 = vmatprep.mubr.f32.mxu1 %v311_v49  ;;  %1732 = vmatmul.mubr.f32.vlgmr.msra.gmra.mrb[0].mxu0 %v319_v33  ;;  %v331_v58 = vand.u32 4294901760, %v330_v51  ;;  %v404_v59 = vand.u32 4294901760, %v403_v52  ;;  %v410_v60 = vsub.f32 %v2189_v5, %v248_v9  ;;  %p1977_p10 = scmp.lt.s32.totalorder %s2508_s11, %s1975_s19  ;;  %p1978_p0 = scmp.lt.s32.totalorder %s1976_s23, %s1970_s8 }
  0x46   : > { %v233_v61 = vsel %vm213_vm0, %v2278_v48, 0  ;;  %1672 = vmatmul.mubr.f32.vlgmr.msra.gmra.mrb[0].mxu1 %v321_v50  ;;  %1792 = vmatprep.subr.bf16.mxu1 %v1791_v53  ;;  %v341_v62 = vand.u32 4294901760, %v340_v54  ;;  %v359_v0 = vand.u32 4294901760, %v2284_v56  ;;  %v236_v4 = vsel %vm213_vm0, %v2287_v57, 0  ;;  %p1973_p8 = pneg %p1972_p13 }
  0x47   : > { %v350_v63 = vsub.f32 %v2273_v46, %v349_v55  ;;  %v2296_v1 = vand.u32 4294901760, %v233_v61  ;;  %1794 = vmatpush3.bf16.msra.mxu1 %v1791_v53  ;;  %1818 = vmatpush3.bf16.msra.mxu0 %v1815_v37  ;;  %v405_v2 = vsub.f32 %v403_v52, %v404_v59  ;;  %v411_v3 = vand.u32 4294901760, %v410_v60  ;;  %p1979_p2 = por %p1978_p0, %p1977_p10 }
  0x48   : > { %1674 = vmatprep.mubr.f32.mxu1 %v331_v58  ;;  %1734 = vmatprep.mubr.f32.mxu0 %v329_v43  ;;  %v360_v6 = vsub.f32 %v2284_v56, %v359_v0  ;;  %v2304_v10 = vand.u32 4294901760, %v236_v4  ;;  %v1799_v36 = vpack.c.bf16 %v2226_v21, %v2214_v17  ;;  %v1803_v42 = vpack.c.bf16 %v410_v60, %v403_v52 }
  0x49   : > { %v351_v5 = vand.u32 4294901760, %v350_v63  ;;  %v2302_v9 = vsub.f32 %v233_v61, %v2296_v1  ;;  %1735 = vmatmul.mubr.f32.gmra.mrb[2].mxu0 %v339_v45  ;;  %v406_v11 = vand.u32 4294901760, %v405_v2  ;;  %v412_v22 = vsub.f32 %v410_v60, %v411_v3  ;;  %p1980_p4 = pnand %p1979_p2, %p1973_p8 }
  0x4a   : > { %v1819_v23 = vpack.c.bf16 %v411_v3, %v404_v59  ;;  %1675 = vmatmul.mubr.f32.gmra.mrb[2].mxu1 %v341_v62  ;;  %1737 = vmatprep.mubr.f32.mxu0 %v349_v55  ;;  %v361_v26 = vand.u32 4294901760, %v360_v6  ;;  %v378_v30 = vsub.f32 %v236_v4, %v2304_v10  ;;  %vm1096_vm4 = vcmask 1044484  }
  0x4b   : > { %v369_v28 = vand.u32 4294901760, %v2302_v9  ;;  %1677 = vmatprep.mubr.f32.mxu1 %v351_v5  ;;  %v413_v31 = vand.u32 4294901760, %v412_v22  ;;  %vm1098_vm5 = vcmask 1045509   ;;  %vm1100_vm6 = vcmask 1046534  }
  0x4c   : > { %1820 = vmatprep.subr.bf16.mxu0 %v1819_v23  ;;  %v379_v33 = vand.u32 4294901760, %v378_v30  ;;  %vm1102_vm7 = vcmask 1047559   ;;  %vm1105_vm8 = vcmask 64512  }
  0x4d   : > { %1822 = vmatpush3.bf16.msra.mxu0 %v1819_v23  ;;  %v370_v32 = vsub.f32 %v2302_v9, %v369_v28  ;;  %v1795_v34 = vpack.c.bf16 %v413_v31, %v406_v11 }
  0x4e   : > { %1738 = vmatmul.mubr.f32.gmra.mrb[4].mxu0 %v359_v0  ;;  %1824 = vmatprep.subr.bf16.mxu0 %v2208_v14  ;;  %v380_v40 = vsub.f32 %v378_v30, %v379_v33 }
  0x4f   : > { %1678 = vmatmul.mubr.f32.gmra.mrb[4].mxu1 %v361_v26  ;;  %v371_v37 = vand.u32 4294901760, %v370_v32  ;;  %1740 = vmatprep.mubr.f32.mxu0 %v369_v28 }
  0x50   : > { %1796 = vmatprep.subr.bf16.mxu1 %v1795_v34  ;;  %v381_v41 = vand.u32 4294901760, %v380_v40 }
  0x51   : > { %1798 = vmatpush3.bf16.msra.mxu1 %v1795_v34  ;;  %1680 = vmatprep.mubr.f32.mxu1 %v371_v37 }
  0x52   : > { %1741 = vmatmul.mubr.f32.gmra.mrb[6].mxu0 %v379_v33  ;;  %1800 = vmatprep.subr.bf16.mxu1 %v1799_v36 }
  0x53   : > { %1681 = vmatmul.mubr.f32.gmra.mrb[6].mxu1 %v381_v41  ;;  %1751 = vmatprep.mubr.f32.mxu0 %v2210_v15 }
  0x54   : > { %1691 = vmatprep.mubr.f32.mxu1 %v2210_v15 }
  0x56   : > { %1752 = vmatmul.mubr.f32.vlgmr.msra.gmra.mrb[0].mxu0 %v2212_v16 }
  0x57   : > { %1692 = vmatmul.mubr.f32.vlgmr.msra.gmra.mrb[0].mxu1 %v2212_v16  ;;  %1826 = vmatpush3.bf16.msra.mxu0 %v2208_v14  ;;  %v2041_v14 = vmov 0  }
  0x58   : > { %1802 = vmatpush3.bf16.msra.mxu1 %v1799_v36  ;;  %1694 = vmatprep.mubr.f32.mxu1 %v2241_v27 }
  0x59   : > { %1754 = vmatprep.mubr.f32.mxu0 %v2241_v27  ;;  %1804 = vmatprep.subr.bf16.mxu1 %v1803_v42 }
  0x5a   : > { %1755 = vmatmul.mubr.f32.gmra.mrb[2].mxu0 %v2246_v29  ;;  %1828 = vmatprep.subr.bf16.mxu0 %v2224_v20 }
  0x5b   : > { %1695 = vmatmul.mubr.f32.gmra.mrb[2].mxu1 %v2246_v29  ;;  %1757 = vmatprep.mubr.f32.mxu0 %v2264_v39 }
  0x5c   : > { %1697 = vmatprep.mubr.f32.mxu1 %v2264_v39  ;;  %1806 = vmatpush3.bf16.msra.mxu1 %v1803_v42 }
  0x5d   : > { %1830 = vmatpush3.bf16.msra.mxu0 %v2224_v20  ;;  %1920 = vset.pattern.permute.xlu0 %v2041_v14 }
  0x5e   : > { %1758 = vmatmul.mubr.f32.gmra.mrb[4].mxu0 %v2275_v47  ;;  %1921 = vset.pattern.permute.xlu1 %v2041_v14 }
  0x5f   : > { %1698 = vmatmul.mubr.f32.gmra.mrb[4].mxu1 %v2275_v47  ;;  %1760 = vmatprep.mubr.f32.mxu0 %v2296_v1 }
  0x60   : > { %1700 = vmatprep.mubr.f32.mxu1 %v2296_v1 }
  0x62   : > { %1761 = vmatmul.mubr.f32.gmra.mrb[6].mxu0 %v2304_v10 }
  0x63   : > { %1701 = vmatmul.mubr.f32.gmra.mrb[6].mxu1 %v2304_v10  ;;  %1771 = vmatprep.mubr.f32.mxu0 %v2210_v15 }
  0x64   : > { %1711 = vmatprep.mubr.f32.mxu1 %v2235_v24 }
  0x66   : > { %1772 = vmatmul.mubr.f32.vlgmr.msra.gmra.mrb[0].mxu0 %v2212_v16 }
  0x67   : > { %1712 = vmatmul.mubr.f32.vlgmr.msra.gmra.mrb[0].mxu1 %v2238_v25  ;;  %1774 = vmatprep.mubr.f32.mxu0 %v2241_v27 }
  0x68   : > { %1714 = vmatprep.mubr.f32.mxu1 %v2258_v35 }
  0x6a   : > { %1775 = vmatmul.mubr.f32.gmra.mrb[2].mxu0 %v2246_v29 }
  0x6b   : > { %1715 = vmatmul.mubr.f32.gmra.mrb[2].mxu1 %v2262_v38  ;;  %1777 = vmatprep.mubr.f32.mxu0 %v2264_v39 }
  0x6c   : > { %1717 = vmatprep.mubr.f32.mxu1 %v2273_v46 }
  0x6e   : > { %1778 = vmatmul.mubr.f32.gmra.mrb[4].mxu0 %v2275_v47 }
  0x6f   : > { %1718 = vmatmul.mubr.f32.gmra.mrb[4].mxu1 %v2284_v56  ;;  %1780 = vmatprep.mubr.f32.mxu0 %v2296_v1  ;;  %v1056_v56 = vlaneseq }
  0x70   : > { %1720 = vmatprep.mubr.f32.mxu1 %v2302_v9 }
  0x71   : > { %v1057_v58 = vand.u32 127, %v1056_v56  ;;  %v2370_v59 = vshrl.u32 %v1056_v56, 7 }
  0x72   : > { %1781 = vmatmul.mubr.f32.gmra.mrb[6].mxu0 %v2304_v10 }
  0x73   : > { %1721 = vmatmul.mubr.f32.gmra.mrb[6].mxu1 %v378_v30  ;;  %v2373_v61 = vsub.s32 %v1057_v58, %v2370_v59  ;;  %v1112_v40 = vsub.s32 0, %v2370_v59  ;;  %v1116_v41 = vsub.s32 1, %v2370_v59  ;;  %v1120_v42 = vsub.s32 2, %v2370_v59 }
  0x74   : > { %v1140_v58 = vsub.s32 7, %v2370_v59 }
 0x139   : > { %v1773_v15 = vpop.f32.mrb[0].mxu0 }
 0x13a   : > { %v1713_v16 = vpop.f32.mrb[0].mxu1  ;;  %v978_v17 = vpop.f32.mrb[1].mxu0 }
 0x13b   : > { %v2346_v20 = vadd.f32 %v1773_v15, %v1713_v16  ;;  %v596_v21 = vpop.f32.mrb[1].mxu1 }
 0x13c   : > { %v2348_v24 = vadd.f32 %v978_v17, %v596_v21  ;;  %v1124_v17 = vsub.s32 3, %v2370_v59 }
 0x13d   : > { %1036 = vperm.xlu0 %1920, %v2346_v20   ;;  %v1776_v25 = vpop.f32.mrb[2].mxu0 }
 0x13e   : > { %v1716_v27 = vpop.f32.mrb[2].mxu1  ;;  %v990_v29 = vpop.f32.mrb[3].mxu0 }
 0x13f   : > { %v2351_v35 = vadd.f32 %v1776_v25, %v1716_v27  ;;  %v610_v38 = vpop.f32.mrb[3].mxu1 }
 0x140   : > { %v2353_v39 = vadd.f32 %v990_v29, %v610_v38  ;;  %v1128_v38 = vsub.s32 4, %v2370_v59 }
 0x141   : > { %1033 = vperm.xlu0 %1920, %v2348_v24   ;;  %1042 = vperm.xlu1 %1921, %v2351_v35   ;;  %v1779_v43 = vpop.f32.mrb[4].mxu0 }
 0x142   : > { %v1719_v44 = vpop.f32.mrb[4].mxu1  ;;  %v1002_v45 = vpop.f32.mrb[5].mxu0 }
 0x143   : > { %v2357_v46 = vadd.f32 %v1779_v43, %v1719_v44  ;;  %v624_v47 = vpop.f32.mrb[5].mxu1 }
 0x144   : > { %v2359_v49 = vadd.f32 %v1002_v45, %v624_v47  ;;  %v1132_v47 = vsub.s32 5, %v2370_v59 }
 0x145   : > { %1039 = vperm.xlu1 %1921, %v2353_v39   ;;  %v1782_v50 = vpop.f32.mrb[6].mxu0 }
 0x146   : > { %1045 = vperm.xlu0 %1920, %v2359_v49   ;;  %v1722_v51 = vpop.f32.mrb[6].mxu1  ;;  %v1014_v52 = vpop.f32.mrb[7].mxu0 }
 0x147   : > { %v2363_v53 = vadd.f32 %v1782_v50, %v1722_v51  ;;  %v638_v54 = vpop.f32.mrb[7].mxu1 }
 0x148   : > { %v2365_v55 = vadd.f32 %v1014_v52, %v638_v54 }
 0x149   : > { %1048 = vperm.xlu1 %1921, %v2357_v46  }
 0x14a   : > { %1051 = vperm.xlu0 %1920, %v2365_v55  }
 0x14d   : > { %1054 = vperm.xlu1 %1921, %v2363_v53  }
 0x1bc   : > { %v1037_v60 = vpop.permute.xlu0 %1036 }
 0x1bd   : > { %v1065_v1 = vrot.slane %v1037_v60, %v2373_v61 }
 0x1c0   : > { %v1034_v62 = vpop.permute.xlu0 %1033  ;;  %v1043_v63 = vpop.permute.xlu1 %1042 }
 0x1c1   : > { %v1061_v0 = vrot.slane %v1034_v62, %v2373_v61  ;;  %v1073_v6 = vrot.slane %v1043_v63, %v2373_v61 }
 0x1c3   : > { %v1091_v5 = vsel %vm1090_vm1, %v1065_v1, %v1061_v0 }
 0x1c4   : > { %v1040_v2 = vpop.permute.xlu1 %1039 }
 0x1c5   : > { %v1069_v3 = vrot.slane %v1040_v2, %v2373_v61  ;;  %v1046_v4 = vpop.permute.xlu0 %1045 }
 0x1c6   : > { %v1077_v9 = vrot.slane %v1046_v4, %v2373_v61 }
 0x1c7   : > { %v1093_v10 = vsel %vm1092_vm2, %v1069_v3, %v1091_v5 }
 0x1c8   : > { %v1095_v11 = vsel %vm1094_vm3, %v1073_v6, %v1093_v10  ;;  %v1049_v22 = vpop.permute.xlu1 %1048 }
 0x1c9   : > { %v1097_v23 = vsel %vm1096_vm4, %v1077_v9, %v1095_v11  ;;  %v1081_v26 = vrot.slane %v1049_v22, %v2373_v61  ;;  %v1052_v28 = vpop.permute.xlu0 %1051 }
 0x1ca   : > { %v1085_v30 = vrot.slane %v1052_v28, %v2373_v61 }
 0x1cb   : > { %v1099_v31 = vsel %vm1098_vm5, %v1081_v26, %v1097_v23 }
 0x1cc   : > { %v1055_v32 = vpop.permute.xlu1 %1054  ;;  %v1101_v34 = vsel %vm1100_vm6, %v1085_v30, %v1099_v31 }
 0x1cd   : > { %v1089_v33 = vrot.slane %v1055_v32, %v2373_v61 }
 0x1cf   : > { %v1103_v36 = vsel %vm1102_vm7, %v1089_v33, %v1101_v34 }
 0x1d0   : > { %v1106_v37 = vsel %vm1105_vm8, %v1103_v36, -inf }
 0x1d1   : > { %1107 = vmax.xlane.f32.xlu0 %v1106_v37 }
 0x25e   : > { %v1108_v14 = vpop.xlane.xlu0 %1107 }
 0x25f   : > { %v1113_v15 = vrot.slane %v1108_v14, %v1112_v40  ;;  %v1117_v16 = vrot.slane %v1108_v14, %v1116_v41  ;;  %v1121_v21 = vrot.slane %v1108_v14, %v1120_v42  ;;  %v1125_v43 = vrot.slane %v1108_v14, %v1124_v17 }
 0x260   : > { %v1129_v50 = vrot.slane %v1108_v14, %v1128_v38  ;;  %v1133_v52 = vrot.slane %v1108_v14, %v1132_v47  ;;  %v1141_v0 = vrot.slane %v1108_v14, %v1140_v58 }
 0x261   : > { %v1150_v25 = vsub.f32 %v2348_v24, %v1113_v15  ;;  %v1151_v27 = vsub.f32 %v2346_v20, %v1117_v16  ;;  %v1152_v44 = vsub.f32 %v2353_v39, %v1121_v21  ;;  %v1153_v51 = vsub.f32 %v2351_v35, %v1125_v43 }
 0x262   : > { %v1136_v20 = vsub.s32 6, %v2370_v59  ;;  %v1154_v54 = vsub.f32 %v2359_v49, %v1129_v50  ;;  %v1155_v35 = vsub.f32 %v2357_v46, %v1133_v52  ;;  %v1157_v3 = vsub.f32 %v2363_v53, %v1141_v0 }
 0x263   : > { %v1158_v29 = vmul.f32 1.442695, %v1150_v25  ;;  %v1160_v45 = vmul.f32 1.442695, %v1151_v27  ;;  %v1162_v24 = vmul.f32 1.442695, %v1152_v44 }
 0x264   : > { %v1164_v39 = vmul.f32 1.442695, %v1153_v51  ;;  %v1137_v60 = vrot.slane %v1108_v14, %v1136_v20  ;;  %v1166_v62 = vmul.f32 1.442695, %v1154_v54  ;;  %v1168_v1 = vmul.f32 1.442695, %v1155_v35 }
 0x265   : > { %1922 = vpow2.f32 %v1158_v29  ;;  %v1172_v46 = vmul.f32 1.442695, %v1157_v3 }
 0x266   : > { %1924 = vpow2.f32 %v1160_v45  ;;  %v1156_v49 = vsub.f32 %v2365_v55, %v1137_v60 }
 0x267   : > { %1926 = vpow2.f32 %v1162_v24 }
 0x268   : > { %1928 = vpow2.f32 %v1164_v39  ;;  %v1170_v4 = vmul.f32 1.442695, %v1156_v49 }
 0x269   : > { %1930 = vpow2.f32 %v1166_v62 }
 0x26a   : > { %1932 = vpow2.f32 %v1168_v1 }
 0x26b   : > { %1934 = vpow2.f32 %v1170_v4 }
 0x26c   : > { %1936 = vpow2.f32 %v1172_v46 }
 0x26f   : > { %v1923_v56 = vpop.eup %1922 }
 0x270   : > { %1183 = vperm.xlu1 %1921, %v1923_v56   ;;  %v1925_v63 = vpop.eup %1924 }
 0x271   : > { %v1927_v2 = vpop.eup %1926 }
 0x272   : > { %v1929_v5 = vpop.eup %1928 }
 0x273   : > { %v1931_v6 = vpop.eup %1930 }
 0x274   : > { %1186 = vperm.xlu1 %1921, %v1925_v63   ;;  %v1933_v9 = vpop.eup %1932 }
 0x275   : > { %v1935_v10 = vpop.eup %1934 }
 0x276   : > { %v1937_v55 = vpop.eup %1936 }
 0x278   : > { %1189 = vperm.xlu1 %1921, %v1927_v2  }
 0x27c   : > { %1192 = vperm.xlu1 %1921, %v1929_v5  }
 0x280   : > { %1195 = vperm.xlu1 %1921, %v1931_v6  }
 0x284   : > { %1198 = vperm.xlu1 %1921, %v1933_v9  }
 0x288   : > { %1201 = vperm.xlu1 %1921, %v1935_v10  }
 0x28c   : > { %1204 = vperm.xlu1 %1921, %v1937_v55  }
 0x2ef   : > { %v1184_v11 = vpop.permute.xlu1 %1183 }
 0x2f0   : > { %v1209_v32 = vrot.slane %v1184_v11, %v2373_v61 }
 0x2f3   : > { %v1187_v22 = vpop.permute.xlu1 %1186 }
 0x2f4   : > { %v1213_v30 = vrot.slane %v1187_v22, %v2373_v61 }
 0x2f6   : > { %v1238_v37 = vsel %vm1090_vm1, %v1213_v30, %v1209_v32 }
 0x2f7   : > { %v1190_v23 = vpop.permute.xlu1 %1189 }
 0x2f8   : > { %v1217_v31 = vrot.slane %v1190_v23, %v2373_v61 }
 0x2fa   : > { %v1239_v15 = vsel %vm1092_vm2, %v1217_v31, %v1238_v37 }
 0x2fb   : > { %v1193_v26 = vpop.permute.xlu1 %1192 }
 0x2fc   : > { %v1221_v33 = vrot.slane %v1193_v26, %v2373_v61 }
 0x2fe   : > { %v1240_v21 = vsel %vm1094_vm3, %v1221_v33, %v1239_v15 }
 0x2ff   : > { %v1196_v53 = vpop.permute.xlu1 %1195 }
 0x300   : > { %v1225_v34 = vrot.slane %v1196_v53, %v2373_v61 }
 0x302   : > { %v1241_v25 = vsel %vm1096_vm4, %v1225_v34, %v1240_v21 }
 0x303   : > { %v1199_v28 = vpop.permute.xlu1 %1198 }
 0x304   : > { %v1229_v14 = vrot.slane %v1199_v28, %v2373_v61 }
 0x306   : > { %v1242_v29 = vsel %vm1098_vm5, %v1229_v14, %v1241_v25 }
 0x307   : > { %v1202_v36 = vpop.permute.xlu1 %1201 }
 0x308   : > { %v1233_v16 = vrot.slane %v1202_v36, %v2373_v61 }
 0x30a   : > { %v1243_v44 = vsel %vm1100_vm6, %v1233_v16, %v1242_v29 }
 0x30b   : > { %v1205_v27 = vpop.permute.xlu1 %1204 }
 0x30c   : > { %v1237_v43 = vrot.slane %v1205_v27, %v2373_v61 }
 0x30e   : > { %v1244_v45 = vsel %vm1102_vm7, %v1237_v43, %v1243_v44 }
 0x30f   : > { %v1246_v50 = vsel %vm1105_vm8, %v1244_v45, 0.0 }
 0x310   : > { %1247 = vadd.xlane.f32.xlu0 %v1246_v50 }
 0x39d   : > { %v1248_v51 = vpop.xlane.xlu0 %1247 }
 0x39e   : > { %1938 = vrcp.f32 %v1248_v51 }
 0x3a8   : > { %v1939_v24 = vpop.eup %1938 }
 0x3a9   : > { %v1258_v52 = vrot.slane %v1939_v24, %v1116_v41  ;;  %v1254_v54 = vrot.slane %v1939_v24, %v1112_v40  ;;  %v1262_v35 = vrot.slane %v1939_v24, %v1120_v42  ;;  %v1266_v0 = vrot.slane %v1939_v24, %v1124_v17 }
 0x3aa   : > { %v1270_v1 = vrot.slane %v1939_v24, %v1128_v38  ;;  %v1274_v40 = vrot.slane %v1939_v24, %v1132_v47  ;;  %v1278_v42 = vrot.slane %v1939_v24, %v1136_v20  ;;  %v1282_v17 = vrot.slane %v1939_v24, %v1140_v58 }
 0x3ab   : > { %v1292_v39 = vmul.f32 %v1925_v63, %v1258_v52  ;;  %v1291_v60 = vmul.f32 %v1923_v56, %v1254_v54  ;;  %v1293_v62 = vmul.f32 %v1927_v2, %v1262_v35  ;;  %v1294_v49 = vmul.f32 %v1929_v5, %v1266_v0 }
 0x3ac   : > { %v1295_v41 = vmul.f32 %v1931_v6, %v1270_v1  ;;  %v1296_v56 = vmul.f32 %v1933_v9, %v1274_v40  ;;  %v1297_v63 = vmul.f32 %v1935_v10, %v1278_v42  ;;  %v1298_v2 = vmul.f32 %v1937_v55, %v1282_v17 }
 0x3ad   : > { %1311 = vperm.xlu0 %1920, %v1292_v39   ;;  %1308 = vperm.xlu1 %1921, %v1291_v60  }
 0x3b1   : > { %1314 = vperm.xlu1 %1921, %v1293_v62  }
 0x3b5   : > { %1317 = vperm.xlu1 %1921, %v1294_v49  }
 0x3b9   : > { %1320 = vperm.xlu1 %1921, %v1295_v41  }
 0x3bd   : > { %1323 = vperm.xlu1 %1921, %v1296_v56  }
 0x3c1   : > { %1326 = vperm.xlu1 %1921, %v1297_v63  }
 0x3c5   : > { %1329 = vperm.xlu1 %1921, %v1298_v2  }
 0x42c   : > { %v1312_v3 = vpop.permute.xlu0 %1311  ;;  %v1309_v38 = vpop.permute.xlu1 %1308 }
 0x42d   : > { %v1381_v4 = vmul.f32 %v1312_v3, %v2195_v8  ;;  %v1380_v5 = vmul.f32 %v1309_v38, %v2192_v7  ;;  %v1334_v34 = vrot.slane %v1309_v38, %v2373_v61 }
 0x42f   : > { %v1395_v47 = vsel %vm213_vm0, %v1381_v4, 0.0  ;;  %v1388_v9 = vsel %vm213_vm0, %v1380_v5, 0.0 }
 0x430   : > { %v1315_v46 = vpop.permute.xlu1 %1314  ;;  %v1396_v6 = vrot.slane %v1395_v47, 4  ;;  %v1389_v55 = vrot.slane %v1388_v9, 4 }
 0x431   : > { %v1382_v20 = vmul.f32 %v1315_v46, %v2203_v12  ;;  %v1342_v14 = vrot.slane %v1315_v46, %v2373_v61 }
 0x432   : > { %v1397_v11 = vadd.f32 %v1396_v6, %v1395_v47  ;;  %v1390_v53 = vadd.f32 %v1389_v55, %v1388_v9 }
 0x433   : > { %v1402_v59 = vsel %vm213_vm0, %v1382_v20, 0.0 }
 0x434   : > { %v1318_v58 = vpop.permute.xlu1 %1317  ;;  %v1403_v22 = vrot.slane %v1402_v59, 4  ;;  %v1398_v12 = vrot.slane %v1397_v11, 2  ;;  %v1391_v37 = vrot.slane %v1390_v53, 2 }
 0x435   : > { %v1383_v10 = vmul.f32 %v1318_v58, %v2206_v13  ;;  %v1338_v13 = vrot.slane %v1312_v3, %v2373_v61  ;;  %v1346_v21 = vrot.slane %v1318_v58, %v2373_v61 }
 0x436   : > { %v1404_v28 = vadd.f32 %v1403_v22, %v1402_v59  ;;  %v1392_v24 = vadd.f32 %v1391_v37, %v1390_v53 }
 0x437   : > { %v1409_v8 = vsel %vm213_vm0, %v1383_v10, 0.0 }
 0x438   : > { %v1410_v7 = vrot.slane %v1409_v8, 4  ;;  %v1321_v23 = vpop.permute.xlu1 %1320  ;;  %v1405_v16 = vrot.slane %v1404_v28, 2  ;;  %v1393_v2 = vrot.slane %v1392_v24, 1 }
 0x439   : > { %v1384_v26 = vmul.f32 %v1321_v23, %v2217_v18  ;;  %v1399_v18 = vadd.f32 %v1398_v12, %v1397_v11  ;;  %v1350_v29 = vrot.slane %v1321_v23, %v2373_v61 }
 0x43a   : > { %v1411_v31 = vadd.f32 %v1410_v7, %v1409_v8  ;;  %v1406_v35 = vadd.f32 %v1405_v16, %v1404_v28  ;;  %v1394_v58 = vadd.f32 %v1393_v2, %v1392_v24 }
 0x43b   : > { %v1416_v30 = vsel %vm213_vm0, %v1384_v26, 0.0  ;;  %v1400_v60 = vrot.slane %v1399_v18, 1 }
 0x43c   : > { %v1417_v32 = vrot.slane %v1416_v30, 4  ;;  %v1324_v33 = vpop.permute.xlu1 %1323  ;;  %v1412_v27 = vrot.slane %v1411_v31, 2  ;;  %v1407_v5 = vrot.slane %v1406_v35, 1 }
 0x43d   : > { %v1385_v36 = vmul.f32 %v1324_v33, %v2220_v19  ;;  %v1363_v19 = vsel %vm1090_vm1, %v1338_v13, %v1334_v34  ;;  %v1354_v50 = vrot.slane %v1324_v33, %v2373_v61  ;;  %v1401_v59 = vadd.f32 %v1400_v60, %v1399_v18 }
 0x43e   : > { %v1418_v15 = vadd.f32 %v1417_v32, %v1416_v30  ;;  %v1364_v52 = vsel %vm1092_vm2, %v1342_v14, %v1363_v19  ;;  %v1413_v49 = vadd.f32 %v1412_v27, %v1411_v31  ;;  %v1408_v11 = vadd.f32 %v1407_v5, %v1406_v35 }
 0x43f   : > { %v1423_v25 = vsel %vm213_vm0, %v1385_v36, 0.0  ;;  %v1365_v62 = vsel %vm1094_vm3, %v1346_v21, %v1364_v52  ;;  %v1452_v26 = vsel %vm1090_vm1, %v1401_v59, %v1394_v58 }
 0x440   : > { %v1424_v43 = vrot.slane %v1423_v25, 4  ;;  %v1327_v44 = vpop.permute.xlu1 %1326  ;;  %v1419_v45 = vrot.slane %v1418_v15, 2  ;;  %v1366_v1 = vsel %vm1096_vm4, %v1350_v29, %v1365_v62  ;;  %v1414_v20 = vrot.slane %v1413_v49, 1 }
 0x441   : > { %v1386_v51 = vmul.f32 %v1327_v44, %v2278_v48  ;;  %v1358_v39 = vrot.slane %v1327_v44, %v2373_v61  ;;  %v1367_v42 = vsel %vm1098_vm5, %v1354_v50, %v1366_v1  ;;  %v1453_v28 = vsel %vm1092_vm2, %v1408_v11, %v1452_v26 }
 0x442   : > { %v1425_v54 = vadd.f32 %v1424_v43, %v1423_v25  ;;  %v1420_v48 = vadd.f32 %v1419_v45, %v1418_v15  ;;  %v1415_v22 = vadd.f32 %v1414_v20, %v1413_v49 }
 0x443   : > { %v1430_v0 = vsel %vm213_vm0, %v1386_v51, 0.0  ;;  %v1368_v38 = vsel %vm1100_vm6, %v1358_v39, %v1367_v42 }
 0x444   : > { %v1426_v41 = vrot.slane %v1425_v54, 2  ;;  %v1431_v40 = vrot.slane %v1430_v0, 4  ;;  %v1330_v56 = vpop.permute.xlu1 %1329  ;;  %v1454_v31 = vsel %vm1094_vm3, %v1415_v22, %v1453_v28 }
 0x445   : > { %v1362_v63 = vrot.slane %v1330_v56, %v2373_v61  ;;  %v1387_v17 = vmul.f32 %v1330_v56, %v2287_v57  ;;  %v1421_v61 = vrot.slane %v1420_v48, 1 }
 0x446   : > { %v1427_v3 = vadd.f32 %v1426_v41, %v1425_v54  ;;  %v1432_v4 = vadd.f32 %v1431_v40, %v1430_v0 }
 0x447   : > { %v1369_v47 = vsel %vm1102_vm7, %v1362_v63, %v1368_v38  ;;  %v1437_v46 = vsel %vm213_vm0, %v1387_v17, 0.0  ;;  %v1422_v23 = vadd.f32 %v1421_v61, %v1420_v48 }
 0x448   : > { %v1433_v6 = vrot.slane %v1432_v4, 2  ;;  %1371 = vst.msk [vmem:[%s200_s29] sm:$0xff] %vm1105_vm8, %v1369_v47  ;;  %v1438_v9 = vrot.slane %v1437_v46, 4  ;;  %v1428_v57 = vrot.slane %v1427_v3, 1 }
 0x449   : > { %v1455_v33 = vsel %vm1096_vm4, %v1422_v23, %v1454_v31 }
 0x44a   : > { %v1434_v10 = vadd.f32 %v1433_v6, %v1432_v4  ;;  %v1439_v55 = vadd.f32 %v1438_v9, %v1437_v46  ;;  %v1429_v53 = vadd.f32 %v1428_v57, %v1427_v3 }
 0x44c   : > { %v1435_v8 = vrot.slane %v1434_v10, 1  ;;  %v1440_v7 = vrot.slane %v1439_v55, 2  ;;  %v1456_v13 = vsel %vm1098_vm5, %v1429_v53, %v1455_v33 }
 0x44e   : > { %v1441_v12 = vadd.f32 %v1440_v7, %v1439_v55  ;;  %v1436_v30 = vadd.f32 %v1435_v8, %v1434_v10 }
 0x450   : > { %v1442_v32 = vrot.slane %v1441_v12, 1  ;;  %v1457_v36 = vsel %vm1100_vm6, %v1436_v30, %v1456_v13 }
 0x452   : > { %v1443_v34 = vadd.f32 %v1442_v32, %v1441_v12 }
 0x454   : > { %v1458_v37 = vsel %vm1102_vm7, %v1443_v34, %v1457_v36 }
 0x455   : > { %1460 = vst.msk [vmem:[%s189_s10] sm:$0xff] %vm213_vm0, %v1458_v37 }
 0x456   : > { %1983 = shalt.err (!%p1980_p4)
}
 0x457   : > { %s1984_s5 = scalar_lea.hbm %s2506_s7, 128  ;;  %s1988_s26 = scalar_lea.hbm %s2554_s2, 256 }
 0x458   : > { %p1985_p5 = scmp.ne.s32.totalorder %s2506_s7, %s1984_s5  ;;  %p1989_p1 = scmp.lt.u32.totalorder %s2506_s7, %s2554_s2 }
 0x459   : > { %p1990_p3 = scmp.lt.u32.totalorder %s1988_s26, %s1984_s5  ;;  %p1992_p11 = scmp.lt.u32.totalorder %s1984_s5, %s2506_s7 }
 0x45a   : > { %p1986_p7 = pnand %p1985_p5, %p2562_p12 }
 0x45b   : > { %p1991_p6 = por %p1990_p3, %p1989_p1 }
 0x45c   : > { %p1987_p9 = pneg %p1986_p7 }
 0x45d   : > { %p1993_p13 = por %p1992_p11, %p1991_p6 }
 0x45f   : > { %p1994_p8 = pnand %p1993_p13, %p1987_p9 }
 0x461   : > { %1997 = shalt.err (!%p1994_p8)
}
 0x462   : > { %1873 = dma.vmem_to_hbm [thread:$0]  (%p2562_p12), %s2508_s11, 128, %s2506_s7, %s1462_s16  }
 0x463 PF: > { %s1494_s29 = sand.u32 1, %s2024_s12   ;;  %p2563_p10 = scmp.ne.s32.totalorder %s2560_s25, 0 }
 0x464   : > { %p2564_p0 = scmp.ge.s32.totalorder %s2036_s15, 2  ;;  %s1495_s30 = scalar_lea.sflag [#allocation4], %s1494_s29 }
 0x466   : > { %p1880_p2 = pnand %p2564_p0, %p2563_p10 }
 0x468   : > { %2019 = dma.done.wait (!%p1880_p2), %s1495_s30, 128  }
 0x469   : > { %2021 = vsyncadd (!%p1880_p2), %s1495_s30, 4294967168  ;;  %p17_p4 = scmp.ge.s32.totalorder %s2088_s18, 4   ;;  %s2565_s12 = smov %s2028_s13 }
 0x46a   : > { %s2566_s13 = smov %s2032_s14  ;;  %s2567_s14 = smov %s2100_s21 }
 0x46b   : > { %s2568_s15 = smov %s2088_s18  ;;  %19 = sbr.rel (!%p17_p4) target bundleno = 5 (0x5), region = 85 }
 0x472   :  { %1507 = vsyncpa [#allocation3], 1 }
 0x473   :  { %1509 = vsyncpa [#allocation3 + $0x1], 1 }
 0x474   :  { %1510 = vsyncpa [#allocation4], 1 }
 0x475   :  { %1512 = vsyncpa [#allocation4 + $0x1], 1 }

</bundles_post_ra>
